<compile_context>
chip_gen: v5e
topology: v5e:2x2
jax: 0.10.0
libtpu: 0.0.40
codegen_flags: <defaults>
</compile_context>

<pallas_src>
import functools

import jax
import jax.numpy as jnp
from jax.experimental import pallas as pl
from jax.experimental.pallas import tpu as pltpu


def _dc_topk_kernel(logits_ref, tgt_ref, ce_ref, tp_ref, fp_ref, fn_ref):
    """Per voxel-tile of one batch element.

    logits_ref: (C, TN) input dtype   tgt_ref: (1, TN) i32
    ce_ref:     (1, TN) f32 per-voxel cross entropy
    tp/fp/fn:   (C, 1)  f32 per-batch accumulators (same block across the
                inner voxel-tile axis)
    """
    i = pl.program_id(1)  # inner voxel-tile index

    @pl.when(i == 0)
    def _():
        tp_ref[...] = jnp.zeros_like(tp_ref)
        fp_ref[...] = jnp.zeros_like(fp_ref)
        fn_ref[...] = jnp.zeros_like(fn_ref)

    x = logits_ref[...].astype(jnp.float32)        # (C, TN)
    t = tgt_ref[...]                               # (1, TN) i32
    C, TN = x.shape

    # softmax over the channel (sublane) axis
    m = jnp.max(x, axis=0, keepdims=True)          # (1, TN)
    e = jnp.exp(x - m)                             # (C, TN)  (EUP)
    s = jnp.sum(e, axis=0, keepdims=True)          # (1, TN)
    inv_s = 1.0 / s                                # only (1, TN) wide
    p = e * inv_s                                  # softmax probabilities

    # one-hot labels via channel iota
    ch = jax.lax.broadcasted_iota(jnp.int32, (C, TN), 0)
    onehot = (ch == t).astype(jnp.float32)         # (C, TN)

    # per-voxel cross entropy: -log softmax[target] = (m + log s) - x[target]
    x_t = jnp.sum(onehot * x, axis=0, keepdims=True)     # (1, TN)
    ce_ref[...] = (m + jnp.log(s)) - x_t

    # soft-dice statistics for this tile, accumulated per channel.
    tp_tile = jnp.sum(p * onehot, axis=1, keepdims=True)  # (C, 1)
    sum_p = jnp.sum(p, axis=1, keepdims=True)             # (C, 1)
    cnt = jnp.sum(onehot, axis=1, keepdims=True)          # (C, 1)
    tp_ref[...] += tp_tile
    fp_ref[...] += sum_p - tp_tile                         # p*(1-onehot)
    fn_ref[...] += cnt - tp_tile                           # (1-p)*onehot


def _pick_tile(hw, cap=4096):
    """Largest multiple of 128 that divides hw, capped at `cap`."""
    assert hw % 128 == 0, "H*W must be a multiple of the 128-lane width"
    tn = min(cap, hw)
    tn -= tn % 128
    while hw % tn != 0:
        tn -= 128
    return tn


@functools.partial(jax.jit, static_argnames=("weight_ce", "weight_dice",
                                             "k_percent", "smooth", "do_bg"))
def dc_and_topk_loss(net_output, target, *, weight_ce=1.0, weight_dice=1.0,
                     k_percent=10.0, smooth=1e-5, do_bg=False):
    """net_output: (B, C, H, W) float logits; target: (B, 1, H, W) int labels."""
    B, C, H, W = net_output.shape
    HW = H * W
    N = B * HW
    TN = _pick_tile(HW)

    # Free reshapes only (no transpose / extra HBM pass):
    logits = net_output.reshape(B, C, HW)          # keep native dtype
    tgt = target.reshape(B, 1, HW).astype(jnp.int32)

    out_shapes = (
        jax.ShapeDtypeStruct((B, 1, HW), jnp.float32),   # per-voxel CE
        jax.ShapeDtypeStruct((B, C, 1), jnp.float32),    # tp per batch element
        jax.ShapeDtypeStruct((B, C, 1), jnp.float32),    # fp
        jax.ShapeDtypeStruct((B, C, 1), jnp.float32),    # fn
    )

    ce_pix, tp_b, fp_b, fn_b = pl.pallas_call(
        _dc_topk_kernel,
        out_shape=out_shapes,
        grid_spec=pltpu.PrefetchScalarGridSpec(
            num_scalar_prefetch=0,
            grid=(B, HW // TN),
            in_specs=[
                pl.BlockSpec((None, C, TN), lambda b, i: (b, 0, i)),
                pl.BlockSpec((None, 1, TN), lambda b, i: (b, 0, i)),
            ],
            out_specs=[
                pl.BlockSpec((None, 1, TN), lambda b, i: (b, 0, i)),
                pl.BlockSpec((None, C, 1), lambda b, i: (b, 0, 0)),
                pl.BlockSpec((None, C, 1), lambda b, i: (b, 0, 0)),
                pl.BlockSpec((None, C, 1), lambda b, i: (b, 0, 0)),
            ],
        ),
        compiler_params=pltpu.CompilerParams(
            # batch axis: independent per-batch accumulators -> megacore-safe;
            # voxel-tile axis: running accumulation -> must stay sequential.
            dimension_semantics=("parallel", "arbitrary"),
            vmem_limit_bytes=32 * 1024 * 1024,
        ),
    )(logits, tgt)

    # SoftDiceLoss (batch_dice=True): sum tp/fp/fn over batch + spatial dims.
    tp = jnp.sum(tp_b[:, :, 0], axis=0)
    fp = jnp.sum(fp_b[:, :, 0], axis=0)
    fn = jnp.sum(fn_b[:, :, 0], axis=0)

    nominator = 2.0 * tp + smooth
    denominator = jnp.clip(2.0 * tp + fp + fn + smooth, 1e-8)
    dc = nominator / denominator
    if not do_bg:
        dc = dc[1:]
    dc_loss = -jnp.mean(dc)

    # TopKLoss: mean of the top k% per-voxel CE values over all voxels.
    k = max(1, int(N * k_percent / 100))
    topk_vals, _ = jax.lax.top_k(ce_pix.reshape(-1), k)
    ce_loss = jnp.mean(topk_vals)

    return weight_ce * ce_loss + weight_dice * dc_loss


def _reference_loss(net_output, target, *, weight_ce=1.0, weight_dice=1.0,
                    k_percent=10.0, smooth=1e-5, do_bg=False):
    """Pure-JAX reference mirroring the PyTorch module semantics."""
    B, C, H, W = net_output.shape
    x = net_output.astype(jnp.float32)
    probs = jax.nn.softmax(x, axis=1)
    logp = jax.nn.log_softmax(x, axis=1)
    onehot = jax.nn.one_hot(target[:, 0], C, axis=1, dtype=jnp.float32)
    tp = jnp.sum(probs * onehot, axis=(0, 2, 3))
    fp = jnp.sum(probs * (1.0 - onehot), axis=(0, 2, 3))
    fn = jnp.sum((1.0 - probs) * onehot, axis=(0, 2, 3))
    dc = (2.0 * tp + smooth) / jnp.clip(2.0 * tp + fp + fn + smooth, 1e-8)
    if not do_bg:
        dc = dc[1:]
    dc_loss = -jnp.mean(dc)
    ce = -jnp.sum(onehot * logp, axis=1)  # (B, H, W)
    N = B * H * W
    k = max(1, int(N * k_percent / 100))
    ce_loss = jnp.mean(jax.lax.top_k(ce.reshape(-1), k)[0])
    return weight_ce * ce_loss + weight_dice * dc_loss


if __name__ == "__main__":
    key = jax.random.PRNGKey(0)
    k1, k2 = jax.random.split(key)
    B, C, H, W = 2, 4, 16, 16
    net_output = jax.random.normal(k1, (B, C, H, W), dtype=jnp.float32)
    target = jax.random.randint(k2, (B, 1, H, W), 0, C, dtype=jnp.int32)

    loss = dc_and_topk_loss(net_output, target)
    jax.block_until_ready(loss)

    ref = _reference_loss(net_output, target)
    assert jnp.allclose(loss, ref, rtol=1e-5, atol=1e-5), (loss, ref)

    print("KERNEL_OK")
</pallas_src>

<mosaic_0001>
module attributes {stable_mosaic.version = 11 : i64} {
  func.func @_dc_topk_kernel(%arg0: i32, %arg1: i32, %arg2: memref<1x4x256xf32, #tpu.memory_space<vmem>>, %arg3: memref<1x1x256xi32, #tpu.memory_space<vmem>>, %arg4: memref<1x1x256xf32, #tpu.memory_space<vmem>>, %arg5: memref<1x4x1xf32, #tpu.memory_space<vmem>>, %arg6: memref<1x4x1xf32, #tpu.memory_space<vmem>>, %arg7: memref<1x4x1xf32, #tpu.memory_space<vmem>>) attributes {dimension_semantics = [#tpu.dimension_semantics<parallel>, #tpu.dimension_semantics<arbitrary>], iteration_bounds = array<i64: 2, 1>, scalar_prefetch = 0 : i64, scratch_operands = 0 : i64, tpu.core_type = #tpu.core_type<tc>, window_params = [{transform_indices = @transform_0, window_bounds = array<i64: 1, 4, 256>}, {transform_indices = @transform_1, window_bounds = array<i64: 1, 1, 256>}, {transform_indices = @transform_2, window_bounds = array<i64: 1, 1, 256>}, {transform_indices = @transform_3, window_bounds = array<i64: 1, 4, 1>}, {transform_indices = @transform_4, window_bounds = array<i64: 1, 4, 1>}, {transform_indices = @transform_5, window_bounds = array<i64: 1, 4, 1>}]} {
    %c0_i32 = arith.constant 0 : i32
    %0 = arith.cmpi eq, %arg1, %c0_i32 : i32
    %1 = arith.extui %0 : i1 to i32
    %c0_i32_0 = arith.constant 0 : i32
    %2 = arith.cmpi ne, %1, %c0_i32_0 : i32
    scf.if %2 {
      %cst_33 = arith.constant 0.000000e+00 : f32
      %59 = vector.broadcast %cst_33 : f32 to vector<4x1xf32>
      %c0_34 = arith.constant 0 : index
      %c0_35 = arith.constant 0 : index
      %c0_36 = arith.constant 0 : index
      %60 = vector.load %arg5[%c0_34, %c0_35, %c0_36] : memref<1x4x1xf32, #tpu.memory_space<vmem>>, vector<1x4x1xf32>
      %61 = vector.shape_cast %60 : vector<1x4x1xf32> to vector<4x1xf32>
      %62 = vector.shape_cast %59 : vector<4x1xf32> to vector<1x4x1xf32>
      tpu.vector_store %arg5[%c0_34, %c0_35, %c0_36], %62 {strides = array<i32>} : memref<1x4x1xf32, #tpu.memory_space<vmem>>, vector<1x4x1xf32>,
      %cst_37 = arith.constant 0.000000e+00 : f32
      %63 = vector.broadcast %cst_37 : f32 to vector<4x1xf32>
      %c0_38 = arith.constant 0 : index
      %c0_39 = arith.constant 0 : index
      %c0_40 = arith.constant 0 : index
      %64 = vector.load %arg6[%c0_38, %c0_39, %c0_40] : memref<1x4x1xf32, #tpu.memory_space<vmem>>, vector<1x4x1xf32>
      %65 = vector.shape_cast %64 : vector<1x4x1xf32> to vector<4x1xf32>
      %66 = vector.shape_cast %63 : vector<4x1xf32> to vector<1x4x1xf32>
      tpu.vector_store %arg6[%c0_38, %c0_39, %c0_40], %66 {strides = array<i32>} : memref<1x4x1xf32, #tpu.memory_space<vmem>>, vector<1x4x1xf32>,
      %cst_41 = arith.constant 0.000000e+00 : f32
      %67 = vector.broadcast %cst_41 : f32 to vector<4x1xf32>
      %c0_42 = arith.constant 0 : index
      %c0_43 = arith.constant 0 : index
      %c0_44 = arith.constant 0 : index
      %68 = vector.load %arg7[%c0_42, %c0_43, %c0_44] : memref<1x4x1xf32, #tpu.memory_space<vmem>>, vector<1x4x1xf32>
      %69 = vector.shape_cast %68 : vector<1x4x1xf32> to vector<4x1xf32>
      %70 = vector.shape_cast %67 : vector<4x1xf32> to vector<1x4x1xf32>
      tpu.vector_store %arg7[%c0_42, %c0_43, %c0_44], %70 {strides = array<i32>} : memref<1x4x1xf32, #tpu.memory_space<vmem>>, vector<1x4x1xf32>,
    } else {
    }
    %c0 = arith.constant 0 : index
    %c0_1 = arith.constant 0 : index
    %c0_2 = arith.constant 0 : index
    %3 = vector.load %arg2[%c0, %c0_1, %c0_2] : memref<1x4x256xf32, #tpu.memory_space<vmem>>, vector<1x4x256xf32>
    %4 = vector.shape_cast %3 : vector<1x4x256xf32> to vector<4x256xf32>
    %c0_3 = arith.constant 0 : index
    %c0_4 = arith.constant 0 : index
    %c0_5 = arith.constant 0 : index
    %5 = vector.load %arg3[%c0_3, %c0_4, %c0_5] : memref<1x1x256xi32, #tpu.memory_space<vmem>>, vector<1x1x256xi32>
    %6 = vector.shape_cast %5 : vector<1x1x256xi32> to vector<1x256xi32>
    %cst = arith.constant dense<0xFF800000> : vector<256xf32>
    %7 = vector.multi_reduction <maximumf>, %4, %cst [0] : vector<4x256xf32> to vector<256xf32>
    %8 = vector.shape_cast %7 : vector<256xf32> to vector<1x256xf32>
    %9 = vector.broadcast %8 : vector<1x256xf32> to vector<4x256xf32>
    %10 = arith.subf %4, %9 : vector<4x256xf32>
    %11 = math.exp %10 : vector<4x256xf32>
    %cst_6 = arith.constant dense<0.000000e+00> : vector<256xf32>
    %12 = vector.multi_reduction <add>, %11, %cst_6 [0] : vector<4x256xf32> to vector<256xf32>
    %13 = vector.shape_cast %12 : vector<256xf32> to vector<1x256xf32>
    %cst_7 = arith.constant 1.000000e+00 : f32
    %14 = vector.broadcast %cst_7 : f32 to vector<1x256xf32>
    %15 = arith.divf %14, %13 : vector<1x256xf32>
    %16 = vector.broadcast %15 : vector<1x256xf32> to vector<4x256xf32>
    %17 = arith.mulf %11, %16 : vector<4x256xf32>
    %18 = tpu.iota {dimensions = array<i32: 0>} : vector<4x256xi32>
    %19 = vector.broadcast %6 : vector<1x256xi32> to vector<4x256xi32>
    %20 = arith.cmpi eq, %18, %19 : vector<4x256xi32>
    %21 = arith.extui %20 : vector<4x256xi1> to vector<4x256xi32>
    %22 = arith.sitofp %21 : vector<4x256xi32> to vector<4x256xf32>
    %23 = arith.mulf %22, %4 : vector<4x256xf32>
    %cst_8 = arith.constant dense<0.000000e+00> : vector<256xf32>
    %24 = vector.multi_reduction <add>, %23, %cst_8 [0] : vector<4x256xf32> to vector<256xf32>
    %25 = vector.shape_cast %24 : vector<256xf32> to vector<1x256xf32>
    %26 = math.log %13 : vector<1x256xf32>
    %27 = arith.addf %8, %26 : vector<1x256xf32>
    %28 = arith.subf %27, %25 : vector<1x256xf32>
    %c0_9 = arith.constant 0 : index
    %c0_10 = arith.constant 0 : index
    %c0_11 = arith.constant 0 : index
    %29 = vector.load %arg4[%c0_9, %c0_10, %c0_11] : memref<1x1x256xf32, #tpu.memory_space<vmem>>, vector<1x1x256xf32>
    %30 = vector.shape_cast %29 : vector<1x1x256xf32> to vector<1x256xf32>
    %31 = vector.shape_cast %28 : vector<1x256xf32> to vector<1x1x256xf32>
    tpu.vector_store %arg4[%c0_9, %c0_10, %c0_11], %31 {strides = array<i32>} : memref<1x1x256xf32, #tpu.memory_space<vmem>>, vector<1x1x256xf32>,
    %32 = arith.mulf %17, %22 : vector<4x256xf32>
    %cst_12 = arith.constant dense<0.000000e+00> : vector<4xf32>
    %33 = vector.multi_reduction <add>, %32, %cst_12 [1] : vector<4x256xf32> to vector<4xf32>
    %34 = vector.shape_cast %33 : vector<4xf32> to vector<4x1xf32>
    %cst_13 = arith.constant dense<0.000000e+00> : vector<4xf32>
    %35 = vector.multi_reduction <add>, %17, %cst_13 [1] : vector<4x256xf32> to vector<4xf32>
    %36 = vector.shape_cast %35 : vector<4xf32> to vector<4x1xf32>
    %cst_14 = arith.constant dense<0.000000e+00> : vector<4xf32>
    %37 = vector.multi_reduction <add>, %22, %cst_14 [1] : vector<4x256xf32> to vector<4xf32>
    %38 = vector.shape_cast %37 : vector<4xf32> to vector<4x1xf32>
    %c0_15 = arith.constant 0 : index
    %c0_16 = arith.constant 0 : index
    %c0_17 = arith.constant 0 : index
    %39 = vector.load %arg5[%c0_15, %c0_16, %c0_17] : memref<1x4x1xf32, #tpu.memory_space<vmem>>, vector<1x4x1xf32>
    %40 = vector.shape_cast %39 : vector<1x4x1xf32> to vector<4x1xf32>
    %41 = arith.addf %40, %34 : vector<4x1xf32>
    %c0_18 = arith.constant 0 : index
    %c0_19 = arith.constant 0 : index
    %c0_20 = arith.constant 0 : index
    %42 = vector.load %arg5[%c0_18, %c0_19, %c0_20] : memref<1x4x1xf32, #tpu.memory_space<vmem>>, vector<1x4x1xf32>
    %43 = vector.shape_cast %42 : vector<1x4x1xf32> to vector<4x1xf32>
    %44 = vector.shape_cast %41 : vector<4x1xf32> to vector<1x4x1xf32>
    tpu.vector_store %arg5[%c0_18, %c0_19, %c0_20], %44 {strides = array<i32>} : memref<1x4x1xf32, #tpu.memory_space<vmem>>, vector<1x4x1xf32>,
    %c0_21 = arith.constant 0 : index
    %c0_22 = arith.constant 0 : index
    %c0_23 = arith.constant 0 : index
    %45 = vector.load %arg6[%c0_21, %c0_22, %c0_23] : memref<1x4x1xf32, #tpu.memory_space<vmem>>, vector<1x4x1xf32>
    %46 = vector.shape_cast %45 : vector<1x4x1xf32> to vector<4x1xf32>
    %47 = arith.subf %36, %34 : vector<4x1xf32>
    %48 = arith.addf %46, %47 : vector<4x1xf32>
    %c0_24 = arith.constant 0 : index
    %c0_25 = arith.constant 0 : index
    %c0_26 = arith.constant 0 : index
    %49 = vector.load %arg6[%c0_24, %c0_25, %c0_26] : memref<1x4x1xf32, #tpu.memory_space<vmem>>, vector<1x4x1xf32>
    %50 = vector.shape_cast %49 : vector<1x4x1xf32> to vector<4x1xf32>
    %51 = vector.shape_cast %48 : vector<4x1xf32> to vector<1x4x1xf32>
    tpu.vector_store %arg6[%c0_24, %c0_25, %c0_26], %51 {strides = array<i32>} : memref<1x4x1xf32, #tpu.memory_space<vmem>>, vector<1x4x1xf32>,
    %c0_27 = arith.constant 0 : index
    %c0_28 = arith.constant 0 : index
    %c0_29 = arith.constant 0 : index
    %52 = vector.load %arg7[%c0_27, %c0_28, %c0_29] : memref<1x4x1xf32, #tpu.memory_space<vmem>>, vector<1x4x1xf32>
    %53 = vector.shape_cast %52 : vector<1x4x1xf32> to vector<4x1xf32>
    %54 = arith.subf %38, %34 : vector<4x1xf32>
    %55 = arith.addf %53, %54 : vector<4x1xf32>
    %c0_30 = arith.constant 0 : index
    %c0_31 = arith.constant 0 : index
    %c0_32 = arith.constant 0 : index
    %56 = vector.load %arg7[%c0_30, %c0_31, %c0_32] : memref<1x4x1xf32, #tpu.memory_space<vmem>>, vector<1x4x1xf32>
    %57 = vector.shape_cast %56 : vector<1x4x1xf32> to vector<4x1xf32>
    %58 = vector.shape_cast %55 : vector<4x1xf32> to vector<1x4x1xf32>
    tpu.vector_store %arg7[%c0_30, %c0_31, %c0_32], %58 {strides = array<i32>} : memref<1x4x1xf32, #tpu.memory_space<vmem>>, vector<1x4x1xf32>,
    return
  }
  func.func @transform_0(%arg0: i32, %arg1: i32) -> (i32, i32, i32) {
    %c0_i32 = arith.constant 0 : i32
    %c0_i32_0 = arith.constant 0 : i32
    return %arg0, %c0_i32, %arg1 : i32, i32, i32
  }
  func.func @transform_1(%arg0: i32, %arg1: i32) -> (i32, i32, i32) {
    %c0_i32 = arith.constant 0 : i32
    %c0_i32_0 = arith.constant 0 : i32
    return %arg0, %c0_i32, %arg1 : i32, i32, i32
  }
  func.func @transform_2(%arg0: i32, %arg1: i32) -> (i32, i32, i32) {
    %c0_i32 = arith.constant 0 : i32
    %c0_i32_0 = arith.constant 0 : i32
    return %arg0, %c0_i32, %arg1 : i32, i32, i32
  }
  func.func @transform_3(%arg0: i32, %arg1: i32) -> (i32, i32, i32) {
    %c0_i32 = arith.constant 0 : i32
    %c0_i32_0 = arith.constant 0 : i32
    %c0_i32_1 = arith.constant 0 : i32
    return %arg0, %c0_i32, %c0_i32_0 : i32, i32, i32
  }
  func.func @transform_4(%arg0: i32, %arg1: i32) -> (i32, i32, i32) {
    %c0_i32 = arith.constant 0 : i32
    %c0_i32_0 = arith.constant 0 : i32
    %c0_i32_1 = arith.constant 0 : i32
    return %arg0, %c0_i32, %c0_i32_0 : i32, i32, i32
  }
  func.func @transform_5(%arg0: i32, %arg1: i32) -> (i32, i32, i32) {
    %c0_i32 = arith.constant 0 : i32
    %c0_i32_0 = arith.constant 0 : i32
    %c0_i32_1 = arith.constant 0 : i32
    return %arg0, %c0_i32, %c0_i32_0 : i32, i32, i32
  }
}

</mosaic_0001>

<bundles_post_ra>
// kernel: dc_and_topk_loss.1
= control target key start
LH: loop header
LB: loop body
LE: loop exit
PB: predicated region body
PF: predicated region fallthrough
CT: control target
= control target key end

     0   :  { %s812_s18 = smov 0   ;;  %s814_s19 = smov 0   ;;  %s917_s0 = inlined_call_operand.vmem [shape: f32[2,4,256], index: 0, kind: input, shape index: {}]   ;;  %s918_s1 = inlined_call_operand.vmem [shape: s32[2,1,256], index: 1, kind: input, shape index: {}]   ;;  %s919_s2 = inlined_call_operand.vmem [shape: f32[2,1,256], index: 2, kind: output, shape index: {0}]   ;;  %s920_s3 = inlined_call_operand.vmem [shape: f32[2,4,1], index: 3, kind: output, shape index: {1}]   ;;  %s921_s4 = inlined_call_operand.vmem [shape: f32[2,4,1], index: 4, kind: output, shape index: {2}]   ;;  %s922_s5 = inlined_call_operand.vmem [shape: f32[2,4,1], index: 5, kind: output, shape index: {3}]  }
   0x1   :  { %s816_s20 = smov 0  }
   0x2 LB: > { %s28_s21 = sadd.s32 1, %s775_s19  ;;  %p709_p0 = scmp.ge.s32.totalorder %s779_s20, 1  ;;  %s779_s20 = sphi %s816_s20, %s16_s20   ;;  %s775_s19 = sphi %s814_s19, %s926_s19   ;;  %s771_s18 = sphi %s812_s18, %s925_s18  }
   0x3   : > { %p30_p1 = scmp.ge.s32.totalorder %s28_s21, 2  ;;  %p231_p2 = scmp.lt.s32.totalorder %s779_s20, 3 }
   0x5   : > { %s928_s21 = smov (%p30_p1, %s28_s21), 0  ;;  %p232_p3 = pnand %p709_p0, %p231_p2 }
   0x6   : > { %p287_p4 = scmp.lt.s32.totalorder (!%p232_p3), %s771_s18, 1 }
   0x7   : > { %235 = sbr.rel (%p232_p3) target bundleno = 238 (0xee), region = 28 }
   0xc   : > { %v421_v0 = vlaneseq  ;;  %s930_s18 = smov (!%p287_p4, %s771_s18), 1  ;;  %vm342_vm2 = vcmask 1043456   ;;  %v781_v6 = vmov 0.0   ;;  %vm463_vm11 = vcmask 1040384  }
   0xd   : > { %s712_s22 = sshll.u32 %s930_s18, 1  ;;  %s721_s23 = sshll.u32 %s930_s18, 3  ;;  %vm330_vm13 = vcmask 3072  }
   0xe   : > { %s303_s26 = scalar_lea.vmem %s918_s1, %s712_s22  ;;  %v422_v1 = vshrl.u32 %v421_v0, 7  ;;  %s294_s29 = scalar_lea.vmem %s917_s0, %s721_s23  ;;  %vm468_vm12 = vcmp.lt.s32.totalorder %v421_v0, 256 }
   0xf   : > { %v335_v2 = vld [vmem:[%s303_s26] sm:$0x3]  ;;  %s312_s7 = scalar_lea.vmem %s919_s2, %s712_s22  ;;  %s714_s8 = sshll.u32 %s930_s18, 2 }
  0x10   : > { %v423_v3 = vperm.slane %v335_v2, 0  ;;  %v424_v4 = vperm.slane %v335_v2, 1  ;;  %v334_v5 = vld [vmem:[%s294_s29] sm:$0xff]  ;;  %s317_s11 = scalar_lea.vmem %s920_s3, %s714_s8  ;;  %s325_s14 = scalar_lea.vmem %s922_s5, %s714_s8 }
  0x11   : > { %337 = vst [vmem:[#allocation1] ss:$2 sm:$0xff] %v334_v5  ;;  %s321_s17 = scalar_lea.vmem %s921_s4, %s714_s8 }
  0x12   : > { %vm425_vm0 = vcmp.eq.s32.totalorder %v422_v1, %v423_v3  ;;  %vm426_vm1 = vcmp.eq.s32.totalorder %v422_v1, %v424_v4  ;;  %331 = vst.msk [vmem:[%s317_s11] sm:$0xf] %vm330_vm13, %v781_v6 }
  0x13   : > { %v717_v7 = vsel %vm425_vm0, 1.0, %v781_v6  ;;  %v718_v8 = vsel %vm426_vm1, 1.0, %v781_v6  ;;  %333 = vst.msk [vmem:[%s325_s14] sm:$0xf] %vm330_vm13, %v781_v6 }
  0x14   : > { %v499_v9 = vsel %vm342_vm2, %v717_v7, 0.0  ;;  %v500_v10 = vsel %vm342_vm2, %v718_v8, 0.0  ;;  %v473_v33 = vrot.slane %v718_v8, 4  ;;  %332 = vst.msk [vmem:[%s321_s17] sm:$0xf] %vm330_vm13, %v781_v6 }
  0x15   : > { %v501_v11 = vadd.f32 %v500_v10, %v499_v9 }
  0x16   : > { %v862_v40 = vsel %vm342_vm2, %v717_v7, %v473_v33 }
  0x17   : > { %502 = vadd.xlane.f32.xlu1 %v501_v11 }
  0x18   : > { %v338_v12 = vld.sshfl [vmem:[#allocation1] sm:$0xff pattern:$0x75316420]  ;;  %v339_v13 = vld.sshfl [vmem:[#allocation1 + $0x8] sm:$0xff pattern:$0x75316420] }
  0x19   : > { %v343_v14 = vsel %vm342_vm2, %v338_v12, -inf  ;;  %v350_v15 = vsel %vm342_vm2, %v339_v13, -inf }
  0x1a   : > { %v344_v16 = vrot.slane %v343_v14, 4  ;;  %v351_v17 = vrot.slane %v350_v15, 4 }
  0x1b   : > { %v508_v6 = vld [vmem:[%s321_s17] sm:$0xf] }
  0x1c   : > { %v345_v18 = vmax.f32 %v343_v14, %v344_v16  ;;  %v352_v19 = vmax.f32 %v350_v15, %v351_v17 }
  0x1e   : > { %v346_v20 = vrot.slane %v345_v18, 2  ;;  %v353_v21 = vrot.slane %v352_v19, 2 }
  0x20   : > { %v347_v22 = vmax.f32 %v345_v18, %v346_v20  ;;  %v354_v23 = vmax.f32 %v352_v19, %v353_v21 }
  0x22   : > { %v348_v24 = vrot.slane %v347_v22, 1  ;;  %v355_v25 = vrot.slane %v354_v23, 1 }
  0x24   : > { %v849_v26 = vmax.f32 %v347_v22, %v348_v24  ;;  %v851_v27 = vmax.f32 %v354_v23, %v355_v25 }
  0x26   : > { %v359_v28 = vrot.slane %v851_v27, 4 }
  0x28   : > { %v360_v29 = vsel %vm342_vm2, %v849_v26, %v359_v28 }
  0x29   : > { %v362_v30 = vsub.f32 %v334_v5, %v360_v29 }
  0x2b   : > { %v363_v31 = vmul.f32 1.442695, %v362_v30 }
  0x2d   : > { %747 = vpow2.f32 %v363_v31 }
  0x33   : > { %v856_v32 = vpop.eup %747 }
  0x34   : > { %366 = vst [vmem:[#allocation1] ss:$2 sm:$0xff] %v856_v32 }
  0x3b   : > { %v367_v34 = vld.sshfl [vmem:[#allocation1] sm:$0xff pattern:$0x75316420]  ;;  %v368_v35 = vld.sshfl [vmem:[#allocation1 + $0x8] sm:$0xff pattern:$0x75316420] }
  0x3c   : > { %v371_v36 = vsel %vm342_vm2, %v367_v34, 0.0  ;;  %v378_v37 = vsel %vm342_vm2, %v368_v35, 0.0  ;;  %431 = vst [vmem:[#allocation1] ss:$2 sm:$0xff] %v334_v5 }
  0x3d   : > { %v372_v38 = vrot.slane %v371_v36, 4  ;;  %v379_v39 = vrot.slane %v378_v37, 4 }
  0x3f   : > { %v373_v41 = vadd.f32 %v372_v38, %v371_v36  ;;  %v380_v42 = vadd.f32 %v379_v39, %v378_v37 }
  0x41   : > { %v374_v43 = vrot.slane %v373_v41, 2  ;;  %v381_v44 = vrot.slane %v380_v42, 2 }
  0x43   : > { %v375_v45 = vadd.f32 %v374_v43, %v373_v41  ;;  %v382_v46 = vadd.f32 %v381_v44, %v380_v42  ;;  %v432_v47 = vld.sshfl [vmem:[#allocation1] sm:$0xff pattern:$0x75316420]  ;;  %v433_v48 = vld.sshfl [vmem:[#allocation1 + $0x8] sm:$0xff pattern:$0x75316420] }
  0x44   : > { %v436_v49 = vmul.f32 %v717_v7, %v432_v47  ;;  %v437_v50 = vmul.f32 %v718_v8, %v433_v48 }
  0x45   : > { %v376_v51 = vrot.slane %v375_v45, 1  ;;  %v383_v52 = vrot.slane %v382_v46, 1 }
  0x46   : > { %v438_v53 = vsel %vm342_vm2, %v436_v49, 0.0  ;;  %v445_v54 = vsel %vm342_vm2, %v437_v50, 0.0 }
  0x47   : > { %v377_v55 = vadd.f32 %v376_v51, %v375_v45  ;;  %v384_v56 = vadd.f32 %v383_v52, %v382_v46  ;;  %v439_v57 = vrot.slane %v438_v53, 4  ;;  %v446_v58 = vrot.slane %v445_v54, 4  ;;  %v504_v52 = vld [vmem:[%s317_s11] sm:$0xf] }
  0x49   : > { %749 = vrcp.f32 %v377_v55  ;;  %v440_v59 = vadd.f32 %v439_v57, %v438_v53  ;;  %v447_v60 = vadd.f32 %v446_v58, %v445_v54  ;;  %vm390_vm3 = vweird.f32 %v377_v55  ;;  %v512_v53 = vld [vmem:[%s325_s14] sm:$0xf] }
  0x4a   : > { %751 = vrcp.f32 %v384_v56  ;;  %v394_v5 = vand.u32 2147483647, %v377_v55  ;;  %v396_v7 = vand.u32 2147483648, %v377_v55  ;;  %vm405_vm5 = vweird.f32 %v384_v56 }
  0x4b   : > { %753 = vlog2.f32 %v377_v55  ;;  %v441_v61 = vrot.slane %v440_v59, 2  ;;  %v448_v62 = vrot.slane %v447_v60, 2  ;;  %v411_v13 = vand.u32 2147483648, %v384_v56 }
  0x4c   : > { %755 = vlog2.f32 %v384_v56  ;;  %v409_v16 = vand.u32 2147483647, %v384_v56  ;;  %v397_v28 = vor.u32 1.1754944e-38, %v396_v7  ;;  %vm395_vm9 = vcmp.eq.f32.partialorder %v394_v5, 8.507059e+37 }
  0x4d   : > { %v442_v1 = vadd.f32 %v441_v61, %v440_v59  ;;  %v449_v2 = vadd.f32 %v448_v62, %v447_v60  ;;  %v412_v29 = vor.u32 1.1754944e-38, %v411_v13 }
  0x4e   : > { %vm410_vm10 = vcmp.eq.f32.partialorder %v409_v16, 8.507059e+37 }
  0x4f   : > { %v750_v63 = vpop.eup %749  ;;  %v443_v9 = vrot.slane %v442_v1, 1  ;;  %v450_v10 = vrot.slane %v449_v2, 1 }
  0x50   : > { %v752_v3 = vpop.eup %751  ;;  %v386_v4 = vmul.f32 %v750_v63, %v377_v55  ;;  %vm391_vm4 = vweird.f32 %v750_v63 }
  0x51   : > { %v401_v8 = vmul.f32 %v752_v3, %v384_v56  ;;  %v754_v11 = vpop.eup %753  ;;  %vm406_vm6 = vweird.f32 %v752_v3  ;;  %v444_v19 = vadd.f32 %v443_v9, %v442_v1  ;;  %v451_v20 = vadd.f32 %v450_v10, %v449_v2  ;;  %vm867_vm7 = vmor %vm390_vm3, %vm391_vm4 }
  0x52   : > { %v387_v12 = vsub.f32 1.0, %v386_v4  ;;  %v756_v14 = vpop.eup %755  ;;  %v453_v17 = vmul.f32 0.6931472, %v754_v11  ;;  %vm407_vm8 = vmor %vm405_vm5, %vm406_vm6 }
  0x53   : > { %v402_v15 = vsub.f32 1.0, %v401_v8  ;;  %v455_v21 = vmul.f32 0.6931472, %v756_v14 }
  0x54   : > { %v388_v18 = vmul.f32 %v750_v63, %v387_v12  ;;  %v456_v24 = vadd.f32 %v453_v17, %v849_v26 }
  0x55   : > { %v403_v23 = vmul.f32 %v752_v3, %v402_v15  ;;  %v457_v30 = vadd.f32 %v455_v21, %v851_v27 }
  0x56   : > { %v389_v25 = vadd.f32 %v750_v63, %v388_v18  ;;  %v458_v34 = vsub.f32 %v456_v24, %v444_v19 }
  0x57   : > { %v404_v31 = vadd.f32 %v752_v3, %v403_v23  ;;  %v459_v35 = vsub.f32 %v457_v30, %v451_v20 }
  0x58   : > { %v393_v33 = vsel %vm867_vm7, %v750_v63, %v389_v25 }
  0x59   : > { %v408_v36 = vsel %vm407_vm8, %v752_v3, %v404_v31  ;;  %v398_v26 = vsel %vm395_vm9, %v397_v28, %v393_v33  ;;  %v462_v37 = vrot.slane %v459_v35, 7 }
  0x5a   : > { %v413_v27 = vsel %vm410_vm10, %v412_v29, %v408_v36 }
  0x5b   : > { %v417_v38 = vrot.slane %v413_v27, 4  ;;  %v464_v39 = vsel %vm463_vm11, %v458_v34, %v462_v37 }
  0x5c   : > { %470 = vst.msk [vmem:[%s312_s7] sm:$0x3] %vm468_vm12, %v464_v39 }
  0x5d   : > { %v418_v41 = vsel %vm342_vm2, %v398_v26, %v417_v38 }
  0x5e   : > { %v420_v42 = vmul.f32 %v856_v32, %v418_v41 }
  0x60   : > { %v476_v43 = vmul.f32 %v862_v40, %v420_v42 }
  0x62   : > { %478 = vst [vmem:[#allocation1] ss:$2 sm:$0xff] %v476_v43 }
  0x69   : > { %v479_v44 = vld.sshfl [vmem:[#allocation1] sm:$0xff pattern:$0x75316420]  ;;  %v480_v0 = vld.sshfl [vmem:[#allocation1 + $0x8] sm:$0xff pattern:$0x75316420] }
  0x6a   : > { %v483_v45 = vsel %vm342_vm2, %v479_v44, 0.0  ;;  %v484_v46 = vsel %vm342_vm2, %v480_v0, 0.0  ;;  %489 = vst [vmem:[#allocation1] ss:$2 sm:$0xff] %v420_v42 }
  0x6b   : > { %v485_v32 = vadd.f32 %v484_v46, %v483_v45 }
  0x6d   : > { %486 = vadd.xlane.f32.xlu0 %v485_v32 }
  0x71   : > { %v490_v40 = vld.sshfl [vmem:[#allocation1] sm:$0xff pattern:$0x75316420]  ;;  %v491_v47 = vld.sshfl [vmem:[#allocation1 + $0x8] sm:$0xff pattern:$0x75316420] }
  0x72   : > { %v494_v48 = vsel %vm342_vm2, %v490_v40, 0.0  ;;  %v495_v49 = vsel %vm342_vm2, %v491_v47, 0.0 }
  0x73   : > { %v496_v50 = vadd.f32 %v495_v49, %v494_v48 }
  0x75   : > { %497 = vadd.xlane.f32.xlu0 %v496_v50 }
  0x8a   : > { %v503_v51 = vpop.xlane.xlu1 %502 }
  0xe0   : > { %v487_v54 = vpop.xlane.xlu0 %486 }
  0xe1   : > { %v505_v55 = vadd.f32 %v504_v52, %v487_v54  ;;  %v513_v56 = vsub.f32 %v503_v51, %v487_v54 }
  0xe3   : > { %507 = vst.msk [vmem:[%s317_s11] sm:$0xf] %vm330_vm13, %v505_v55  ;;  %v514_v57 = vadd.f32 %v513_v56, %v512_v53 }
  0xe5   : > { %515 = vst.msk [vmem:[%s325_s14] sm:$0xf] %vm330_vm13, %v514_v57 }
  0xe8   : > { %v498_v58 = vpop.xlane.xlu0 %497 }
  0xe9   : > { %v509_v59 = vsub.f32 %v498_v58, %v487_v54 }
  0xeb   : > { %v510_v60 = vadd.f32 %v509_v59, %v508_v6 }
  0xed   : > { %511 = vst.msk [vmem:[%s321_s17] sm:$0xf] %vm330_vm13, %v510_v60 }
  0xee PF: > { %s16_s20 = sadd.s32 1, %s779_s20   ;;  %s925_s18 = smov %s775_s19 }
  0xef   : > { %p13_p5 = scmp.ge.s32.totalorder %s16_s20, 4   ;;  %s926_s19 = smov %s928_s21 }
  0xf1   :  { %15 = sbr.rel (!%p13_p5) target bundleno = 2 (0x2), region = 101 }

</bundles_post_ra>
